<compile_context>
chip_gen: v7x
topology: tpu7x:2x2x1
jax: 0.10.0
libtpu: 0.0.40
codegen_flags: <defaults>
</compile_context>

<pallas_src>
import functools

import jax
import jax.numpy as jnp
from jax.experimental import pallas as pl
from jax.experimental.pallas import tpu as pltpu


def _make_net2_kernel(h_layers_obs, h_layers_f):
    """Kernel closure for a fixed layer count.

    Refs: x_ref [bb, D], w_ref [L, D, D], b_ref [L, 1, D], out_ref [bb, D].
    Slab layer order (see pack_params):
      0                      : fused layer 0 (obs layer 0 + feat pre-activation)
      1 .. h_layers_obs-1    : remaining hidden_obs layers (Linear + ReLU)
      h_layers_obs           : fused first hidden_f layer (output_obs +
                               expanding_layer + concat folded in)
      ...                    : remaining hidden_f layers (Linear + ReLU)
      last                   : output layer (+ log_softmax over all D lanes)
    """

    def kernel(x_ref, w_ref, b_ref, out_ref):
        x = x_ref[...]

        # Fused layer 0: one matmul produces both the feat pre-activation
        # (cols [0:n_f]) and the obs layer-0 pre-activation (cols [n_f:n_f+n_obs]).
        z0 = jnp.dot(x, w_ref[0], preferred_element_type=jnp.float32) + b_ref[0]
        # ReLU the whole row; the ReLU'd feat columns are junk for the obs
        # chain but are multiplied by zero weight rows in the next layer.
        h = jnp.maximum(z0, 0.0)
        li = 1

        # Remaining hidden_obs layers (dropout p=0 -> identity).
        for _ in range(h_layers_obs - 1):
            h = jnp.maximum(
                jnp.dot(h, w_ref[li], preferred_element_type=jnp.float32)
                + b_ref[li], 0.0)
            li += 1

        # Fused first hidden_f layer: output_obs + expanding_layer + concat are
        # folded into this matmul; the feat term is z0's cols [0:n_f] (its
        # other non-zero cols are junk, killed by zero weight rows next layer).
        h = jnp.maximum(
            jnp.dot(h, w_ref[li], preferred_element_type=jnp.float32)
            + z0 + b_ref[li], 0.0)
        li += 1

        # Remaining hidden_f layers.
        for _ in range(h_layers_f - 1):
            h = jnp.maximum(
                jnp.dot(h, w_ref[li], preferred_element_type=jnp.float32)
                + b_ref[li], 0.0)
            li += 1

        # Final linear + log_softmax over the full D lanes.  Padded lanes carry
        # a -1e30 bias (finite), so exp underflows to 0 and the real lanes get
        # an exact log_softmax; the wrapper slices them off.
        logits = (jnp.dot(h, w_ref[li], preferred_element_type=jnp.float32)
                  + b_ref[li])
        m = jnp.max(logits, axis=1, keepdims=True)
        s = logits - m
        out_ref[...] = s - jnp.log(jnp.sum(jnp.exp(s), axis=1, keepdims=True))

    return kernel


def pack_params(params, *, h_layers_obs, h_layers_f, neg_fill=-1e30):
    """Fuse + pack the PyTorch-ordered params into two lane-dense slabs.

    `params` is a list of (W [in,out], b [1,out]) in PyTorch module order:
      hidden_obs*, output_obs, expanding_layer, hidden_f*, output.

    Returns (w_slab [L, D, D] f32, b_slab [L, 1, D] f32) with
      L = h_layers_obs + h_layers_f + 1 and D a multiple of 128.
    Done once, offline; keep the slabs resident on device across calls.
    """
    assert h_layers_obs >= 1 and h_layers_f >= 1
    i = 0
    obs = params[i:i + h_layers_obs]; i += h_layers_obs
    w_out_obs, b_out_obs = params[i]; i += 1
    w_exp, b_exp = params[i]; i += 1
    hidden_f = params[i:i + h_layers_f]; i += h_layers_f
    w_out, b_out = params[i]; i += 1

    inputs = obs[0][0].shape[0]          # x has inputs + 2 columns
    n_obs = obs[0][0].shape[1]           # h_nodes_obs
    outputs_obs = w_out_obs.shape[1]
    n_f = hidden_f[0][0].shape[1]        # h_nodes_f
    outputs = w_out.shape[1]

    # Fuse the activation-free chain output_obs / expanding_layer / concat into
    # hidden_f[0]:
    #   cat(h_obs @ Wo + bo, x_feat @ We + be) @ W1_f + b1_f
    #     = h_obs @ (Wo @ W1_top) + x_feat @ (We @ W1_bot)
    #       + (bo @ W1_top + be @ W1_bot + b1_f)
    w1_f, b1_f = hidden_f[0]
    w1_top = w1_f[:outputs_obs, :]
    w1_bot = w1_f[outputs_obs:, :]
    w_a = w_out_obs @ w1_top                               # [n_obs, n_f]
    w_b = w_exp @ w1_bot                                   # [2, n_f]
    b_fused = b_out_obs @ w1_top + b_exp @ w1_bot + b1_f   # [1, n_f]

    # Lane-dense square slab width: multiple of 128 and big enough for every
    # fan_in/fan_out and for the fused layer-0 column layout [feat | obs].
    dims = [inputs + 2, n_obs, n_f, outputs, n_f + n_obs]
    D = max(128, ((max(dims) + 127) // 128) * 128)

    def place(w, b, row_off=0, col_off=0, bias_fill=0.0):
        """Embed W [r,c] / b [1,c] at (row_off, col_off) of a D x D / 1 x D tile."""
        w = jnp.asarray(w, jnp.float32)
        b = jnp.asarray(b, jnp.float32)
        r, c = w.shape
        wt = jnp.zeros((D, D), jnp.float32).at[
            row_off:row_off + r, col_off:col_off + c].set(w)
        bt = jnp.full((1, D), bias_fill, jnp.float32).at[
            :, col_off:col_off + c].set(b)
        return wt, bt

    layers = []

    # Fused layer 0:
    #   cols [0:n_f]          <- x[:, -2:] @ (W_exp @ W1_f_bot)   (feat, no ReLU use)
    #   cols [n_f:n_f+n_obs]  <- x[:, :-2] @ W0_obs + b0          (obs pre-activation)
    w0, b0 = obs[0]
    w_l0 = jnp.zeros((D, D), jnp.float32)
    w_l0 = w_l0.at[inputs:inputs + 2, 0:n_f].set(jnp.asarray(w_b, jnp.float32))
    w_l0 = w_l0.at[0:inputs, n_f:n_f + n_obs].set(jnp.asarray(w0, jnp.float32))
    b_l0 = jnp.zeros((1, D), jnp.float32).at[
        :, n_f:n_f + n_obs].set(jnp.asarray(b0, jnp.float32))
    layers.append((w_l0, b_l0))

    # The next consumer of the obs chain must read cols [n_f:n_f+n_obs] -> its
    # weight rows are shifted by n_f; later obs layers live at cols [0:n_obs].
    obs_row_off = n_f
    for (w, b) in obs[1:]:
        layers.append(place(w, b, row_off=obs_row_off))
        obs_row_off = 0

    # Fused first hidden_f layer (output_obs/expanding_layer/concat folded in).
    layers.append(place(w_a, b_fused, row_off=obs_row_off))

    for (w, b) in hidden_f[1:]:
        layers.append(place(w, b))

    # Output layer: padded bias lanes get a large negative FINITE value so the
    # full-lane log_softmax ignores them (exp underflows to 0, no NaNs).
    layers.append(place(w_out, b_out, bias_fill=neg_fill))

    w_slab = jnp.stack([w for w, _ in layers])
    b_slab = jnp.stack([b for _, b in layers])
    return w_slab, b_slab


def net2_forward(x, w_slab, b_slab, *, h_layers_obs, h_layers_f, outputs,
                 batch_block=1024):
    """x: [B, inputs + 2] f32. w_slab/b_slab from pack_params (keep them live
    across calls so the packing cost is paid once)."""
    x = x.astype(jnp.float32)
    B, F = x.shape
    L, D, D2 = w_slab.shape
    assert D == D2 and F <= D
    assert L == h_layers_obs + h_layers_f + 1

    # ---- Batch block selection -------------------------------------------
    # Big blocks amortize the ~0.35us per-grid-step overhead and DMA latency;
    # for large B keep >= 2 grid steps so both v7x TensorCores participate.
    bb = min(batch_block, B)
    if B >= 256:
        bb = min(bb, -(-B // 2))
    bb = max(8, ((bb + 7) // 8) * 8)

    # VMEM budget: double-buffered x + out blocks plus the resident slabs.
    slab_bytes = int(w_slab.size + b_slab.size) * 4
    while bb > 8 and (4 * bb * D * 4 + 2 * slab_bytes) > (40 << 20):
        bb = max(8, (bb // 2 + 7) // 8 * 8)
    vmem_est = 4 * bb * D * 4 + 2 * slab_bytes + (2 << 20)
    vmem_limit = None
    if vmem_est > (16 << 20):          # above v5e's default scoped VMEM
        vmem_limit = int(min(vmem_est, 48 << 20))   # headroom on v7x's 64 MiB

    # Pad the batch up to a multiple of bb (never collapse to one giant block).
    n_blocks = -(-B // bb)
    b_pad = n_blocks * bb
    if b_pad != B or F != D:
        x = jnp.pad(x, ((0, b_pad - B), (0, D - F)))

    kernel = _make_net2_kernel(h_layers_obs, h_layers_f)

    out = pl.pallas_call(
        kernel,
        out_shape=jax.ShapeDtypeStruct((b_pad, D), jnp.float32),
        grid_spec=pltpu.PrefetchScalarGridSpec(
            num_scalar_prefetch=0,
            grid=(n_blocks,),
            in_specs=[
                pl.BlockSpec((bb, D), lambda i: (i, 0)),
                pl.BlockSpec((L, D, D), lambda i: (0, 0, 0)),   # resident weights
                pl.BlockSpec((L, 1, D), lambda i: (0, 0, 0)),   # resident biases
            ],
            out_specs=pl.BlockSpec((bb, D), lambda i: (i, 0)),
        ),
        compiler_params=pltpu.CompilerParams(
            dimension_semantics=("parallel",),
            vmem_limit_bytes=vmem_limit),
    )(x, w_slab, b_slab)

    # Lane-dense [b_pad, D] result; strip batch padding and padded lanes here.
    return out[:B, :outputs]


def init_params(key, *, inputs, h_nodes_obs, h_layers_obs, outputs,
                h_nodes_f, h_layers_f, outputs_obs, outputs_f):
    """PyTorch-style uniform(+-1/sqrt(fan_in)) init. Returns list of
    (W [in,out], b [1,out]) in PyTorch module order."""
    def linear(key, fan_in, fan_out):
        kw, kb = jax.random.split(key)
        bound = 1.0 / jnp.sqrt(fan_in)
        w = jax.random.uniform(kw, (fan_in, fan_out), jnp.float32, -bound, bound)
        b = jax.random.uniform(kb, (1, fan_out), jnp.float32, -bound, bound)
        return w, b

    params = []
    keys = jax.random.split(key, h_layers_obs + h_layers_f + 3)
    ki = 0
    for h in range(h_layers_obs):
        fan_in = inputs if h == 0 else h_nodes_obs
        params.append(linear(keys[ki], fan_in, h_nodes_obs)); ki += 1
    params.append(linear(keys[ki], h_nodes_obs, outputs_obs)); ki += 1
    params.append(linear(keys[ki], 2, outputs_f)); ki += 1
    for h in range(h_layers_f):
        fan_in = (outputs_obs + outputs_f) if h == 0 else h_nodes_f
        params.append(linear(keys[ki], fan_in, h_nodes_f)); ki += 1
    params.append(linear(keys[ki], h_nodes_f, outputs)); ki += 1
    return params


def net2_reference(x, params, *, h_layers_obs, h_layers_f):
    """Pure-JAX reference mirroring the (unfused) PyTorch forward."""
    x_obs = x[:, :-2]
    x_feat = x[:, -2:]
    i = 0
    for _ in range(h_layers_obs):
        w, b = params[i]; i += 1
        x_obs = jax.nn.relu(x_obs @ w + b)
    w, b = params[i]; i += 1
    x_obs = x_obs @ w + b
    w, b = params[i]; i += 1
    x_feat = x_feat @ w + b
    h = jnp.concatenate([x_obs, x_feat], axis=1)
    for _ in range(h_layers_f):
        w, b = params[i]; i += 1
        h = jax.nn.relu(h @ w + b)
    w, b = params[i]; i += 1
    logits = h @ w + b
    return jax.nn.log_softmax(logits, axis=1)


if __name__ == "__main__":
    # Small shapes consistent with the module's forward.
    INPUTS = 30          # observation features (x has INPUTS + 2 columns)
    H_NODES_OBS = 32
    H_LAYERS_OBS = 2
    OUTPUTS = 16
    H_NODES_F = 32
    H_LAYERS_F = 2
    OUTPUTS_OBS = 16
    OUTPUTS_F = 16
    BATCH = 8

    key = jax.random.PRNGKey(0)
    k_x, k_x2, k_p = jax.random.split(key, 3)
    x = jax.random.normal(k_x, (BATCH, INPUTS + 2), dtype=jnp.float32)
    params = init_params(
        k_p, inputs=INPUTS, h_nodes_obs=H_NODES_OBS, h_layers_obs=H_LAYERS_OBS,
        outputs=OUTPUTS, h_nodes_f=H_NODES_F, h_layers_f=H_LAYERS_F,
        outputs_obs=OUTPUTS_OBS, outputs_f=OUTPUTS_F)

    # Pack / fuse once; keep the slabs resident across calls.
    # TODO(synk): in a steady-state inference loop, stack many timesteps/agents
    # into the batch dimension of a single net2_forward call (and reuse
    # w_slab/b_slab across calls) so per-call dispatch overhead is amortized.
    w_slab, b_slab = pack_params(
        params, h_layers_obs=H_LAYERS_OBS, h_layers_f=H_LAYERS_F)

    fwd = functools.partial(net2_forward, h_layers_obs=H_LAYERS_OBS,
                            h_layers_f=H_LAYERS_F, outputs=OUTPUTS)

    # Demo batch (single grid block).
    out = jax.block_until_ready(fwd(x, w_slab, b_slab))
    ref = net2_reference(x, params, h_layers_obs=H_LAYERS_OBS,
                         h_layers_f=H_LAYERS_F)
    assert out.shape == (BATCH, OUTPUTS)
    # Relaxed tolerance: the offline weight fusion reorders f32 sums.
    assert jnp.allclose(out, ref, atol=1e-4, rtol=1e-4), "mismatch vs JAX reference"

    # Non-divisible batch with a small block: exercises batch padding and a
    # multi-step (megacore-shardable) grid.
    x2 = jax.random.normal(k_x2, (40, INPUTS + 2), dtype=jnp.float32)
    out2 = jax.block_until_ready(fwd(x2, w_slab, b_slab, batch_block=16))
    ref2 = net2_reference(x2, params, h_layers_obs=H_LAYERS_OBS,
                          h_layers_f=H_LAYERS_F)
    assert out2.shape == (40, OUTPUTS)
    assert jnp.allclose(out2, ref2, atol=1e-4, rtol=1e-4), "mismatch (padded batch)"

    print("KERNEL_OK")
</pallas_src>

<mosaic_0001>
module attributes {stable_mosaic.version = 11 : i64} {
  func.func @kernel(%arg0: i32, %arg1: memref<8x128xf32, #tpu.memory_space<vmem>>, %arg2: memref<5x128x128xf32, #tpu.memory_space<vmem>>, %arg3: memref<5x1x128xf32, #tpu.memory_space<vmem>>, %arg4: memref<8x128xf32, #tpu.memory_space<vmem>>) attributes {dimension_semantics = [#tpu.dimension_semantics<parallel>], iteration_bounds = array<i64: 1>, scalar_prefetch = 0 : i64, scratch_operands = 0 : i64, tpu.core_type = #tpu.core_type<tc>, window_params = [{transform_indices = @transform_0, window_bounds = array<i64: 8, 128>}, {pipeline_mode = #tpu.pipeline_mode<synchronous>, transform_indices = @transform_1, window_bounds = array<i64: 5, 128, 128>}, {pipeline_mode = #tpu.pipeline_mode<synchronous>, transform_indices = @transform_2, window_bounds = array<i64: 5, 1, 128>}, {transform_indices = @transform_3, window_bounds = array<i64: 8, 128>}]} {
    %c0 = arith.constant 0 : index
    %c0_0 = arith.constant 0 : index
    %0 = vector.load %arg1[%c0, %c0_0] : memref<8x128xf32, #tpu.memory_space<vmem>>, vector<8x128xf32>
    %c0_1 = arith.constant 0 : index
    %c0_2 = arith.constant 0 : index
    %c0_3 = arith.constant 0 : index
    %1 = vector.load %arg2[%c0_1, %c0_2, %c0_3] : memref<5x128x128xf32, #tpu.memory_space<vmem>>, vector<1x128x128xf32>
    %2 = vector.shape_cast %1 : vector<1x128x128xf32> to vector<128x128xf32>
    %cst = arith.constant dense<0.000000e+00> : vector<8x128xf32>
    %3 = tpu.matmul %0, %2, %cst {dimension_numbers = #tpu.dot_dimension_numbers<[1], [0], [0], [1], [0, 0, 1, 1], [], []>} : vector<8x128xf32>, vector<128x128xf32>, vector<8x128xf32> -> vector<8x128xf32>
    %c0_4 = arith.constant 0 : index
    %c0_5 = arith.constant 0 : index
    %c0_6 = arith.constant 0 : index
    %4 = vector.load %arg3[%c0_4, %c0_5, %c0_6] : memref<5x1x128xf32, #tpu.memory_space<vmem>>, vector<1x1x128xf32>
    %5 = vector.shape_cast %4 : vector<1x1x128xf32> to vector<1x128xf32>
    %6 = vector.broadcast %5 : vector<1x128xf32> to vector<8x128xf32>
    %7 = arith.addf %3, %6 : vector<8x128xf32>
    %cst_7 = arith.constant 0.000000e+00 : f32
    %8 = vector.broadcast %cst_7 : f32 to vector<8x128xf32>
    %9 = arith.maximumf %7, %8 : vector<8x128xf32>
    %c1 = arith.constant 1 : index
    %c0_8 = arith.constant 0 : index
    %c0_9 = arith.constant 0 : index
    %10 = vector.load %arg2[%c1, %c0_8, %c0_9] : memref<5x128x128xf32, #tpu.memory_space<vmem>>, vector<1x128x128xf32>
    %11 = vector.shape_cast %10 : vector<1x128x128xf32> to vector<128x128xf32>
    %cst_10 = arith.constant dense<0.000000e+00> : vector<8x128xf32>
    %12 = tpu.matmul %9, %11, %cst_10 {dimension_numbers = #tpu.dot_dimension_numbers<[1], [0], [0], [1], [0, 0, 1, 1], [], []>} : vector<8x128xf32>, vector<128x128xf32>, vector<8x128xf32> -> vector<8x128xf32>
    %c1_11 = arith.constant 1 : index
    %c0_12 = arith.constant 0 : index
    %c0_13 = arith.constant 0 : index
    %13 = vector.load %arg3[%c1_11, %c0_12, %c0_13] : memref<5x1x128xf32, #tpu.memory_space<vmem>>, vector<1x1x128xf32>
    %14 = vector.shape_cast %13 : vector<1x1x128xf32> to vector<1x128xf32>
    %15 = vector.broadcast %14 : vector<1x128xf32> to vector<8x128xf32>
    %16 = arith.addf %12, %15 : vector<8x128xf32>
    %cst_14 = arith.constant 0.000000e+00 : f32
    %17 = vector.broadcast %cst_14 : f32 to vector<8x128xf32>
    %18 = arith.maximumf %16, %17 : vector<8x128xf32>
    %c2 = arith.constant 2 : index
    %c0_15 = arith.constant 0 : index
    %c0_16 = arith.constant 0 : index
    %19 = vector.load %arg2[%c2, %c0_15, %c0_16] : memref<5x128x128xf32, #tpu.memory_space<vmem>>, vector<1x128x128xf32>
    %20 = vector.shape_cast %19 : vector<1x128x128xf32> to vector<128x128xf32>
    %cst_17 = arith.constant dense<0.000000e+00> : vector<8x128xf32>
    %21 = tpu.matmul %18, %20, %cst_17 {dimension_numbers = #tpu.dot_dimension_numbers<[1], [0], [0], [1], [0, 0, 1, 1], [], []>} : vector<8x128xf32>, vector<128x128xf32>, vector<8x128xf32> -> vector<8x128xf32>
    %22 = arith.addf %21, %7 : vector<8x128xf32>
    %c2_18 = arith.constant 2 : index
    %c0_19 = arith.constant 0 : index
    %c0_20 = arith.constant 0 : index
    %23 = vector.load %arg3[%c2_18, %c0_19, %c0_20] : memref<5x1x128xf32, #tpu.memory_space<vmem>>, vector<1x1x128xf32>
    %24 = vector.shape_cast %23 : vector<1x1x128xf32> to vector<1x128xf32>
    %25 = vector.broadcast %24 : vector<1x128xf32> to vector<8x128xf32>
    %26 = arith.addf %22, %25 : vector<8x128xf32>
    %cst_21 = arith.constant 0.000000e+00 : f32
    %27 = vector.broadcast %cst_21 : f32 to vector<8x128xf32>
    %28 = arith.maximumf %26, %27 : vector<8x128xf32>
    %c3 = arith.constant 3 : index
    %c0_22 = arith.constant 0 : index
    %c0_23 = arith.constant 0 : index
    %29 = vector.load %arg2[%c3, %c0_22, %c0_23] : memref<5x128x128xf32, #tpu.memory_space<vmem>>, vector<1x128x128xf32>
    %30 = vector.shape_cast %29 : vector<1x128x128xf32> to vector<128x128xf32>
    %cst_24 = arith.constant dense<0.000000e+00> : vector<8x128xf32>
    %31 = tpu.matmul %28, %30, %cst_24 {dimension_numbers = #tpu.dot_dimension_numbers<[1], [0], [0], [1], [0, 0, 1, 1], [], []>} : vector<8x128xf32>, vector<128x128xf32>, vector<8x128xf32> -> vector<8x128xf32>
    %c3_25 = arith.constant 3 : index
    %c0_26 = arith.constant 0 : index
    %c0_27 = arith.constant 0 : index
    %32 = vector.load %arg3[%c3_25, %c0_26, %c0_27] : memref<5x1x128xf32, #tpu.memory_space<vmem>>, vector<1x1x128xf32>
    %33 = vector.shape_cast %32 : vector<1x1x128xf32> to vector<1x128xf32>
    %34 = vector.broadcast %33 : vector<1x128xf32> to vector<8x128xf32>
    %35 = arith.addf %31, %34 : vector<8x128xf32>
    %cst_28 = arith.constant 0.000000e+00 : f32
    %36 = vector.broadcast %cst_28 : f32 to vector<8x128xf32>
    %37 = arith.maximumf %35, %36 : vector<8x128xf32>
    %c4 = arith.constant 4 : index
    %c0_29 = arith.constant 0 : index
    %c0_30 = arith.constant 0 : index
    %38 = vector.load %arg2[%c4, %c0_29, %c0_30] : memref<5x128x128xf32, #tpu.memory_space<vmem>>, vector<1x128x128xf32>
    %39 = vector.shape_cast %38 : vector<1x128x128xf32> to vector<128x128xf32>
    %cst_31 = arith.constant dense<0.000000e+00> : vector<8x128xf32>
    %40 = tpu.matmul %37, %39, %cst_31 {dimension_numbers = #tpu.dot_dimension_numbers<[1], [0], [0], [1], [0, 0, 1, 1], [], []>} : vector<8x128xf32>, vector<128x128xf32>, vector<8x128xf32> -> vector<8x128xf32>
    %c4_32 = arith.constant 4 : index
    %c0_33 = arith.constant 0 : index
    %c0_34 = arith.constant 0 : index
    %41 = vector.load %arg3[%c4_32, %c0_33, %c0_34] : memref<5x1x128xf32, #tpu.memory_space<vmem>>, vector<1x1x128xf32>
    %42 = vector.shape_cast %41 : vector<1x1x128xf32> to vector<1x128xf32>
    %43 = vector.broadcast %42 : vector<1x128xf32> to vector<8x128xf32>
    %44 = arith.addf %40, %43 : vector<8x128xf32>
    %cst_35 = arith.constant dense<0xFF800000> : vector<8xf32>
    %45 = vector.multi_reduction <maximumf>, %44, %cst_35 [1] : vector<8x128xf32> to vector<8xf32>
    %46 = vector.shape_cast %45 : vector<8xf32> to vector<8x1xf32>
    %47 = vector.broadcast %46 : vector<8x1xf32> to vector<8x128xf32>
    %48 = arith.subf %44, %47 : vector<8x128xf32>
    %49 = math.exp %48 : vector<8x128xf32>
    %cst_36 = arith.constant dense<0.000000e+00> : vector<8xf32>
    %50 = vector.multi_reduction <add>, %49, %cst_36 [1] : vector<8x128xf32> to vector<8xf32>
    %51 = vector.shape_cast %50 : vector<8xf32> to vector<8x1xf32>
    %52 = math.log %51 : vector<8x1xf32>
    %53 = vector.broadcast %52 : vector<8x1xf32> to vector<8x128xf32>
    %54 = arith.subf %48, %53 : vector<8x128xf32>
    %c0_37 = arith.constant 0 : index
    %c0_38 = arith.constant 0 : index
    %55 = vector.load %arg4[%c0_37, %c0_38] : memref<8x128xf32, #tpu.memory_space<vmem>>, vector<8x128xf32>
    tpu.vector_store %arg4[%c0_37, %c0_38], %54 {strides = array<i32>} : memref<8x128xf32, #tpu.memory_space<vmem>>, vector<8x128xf32>,
    return
  }
  func.func @transform_0(%arg0: i32) -> (i32, i32) {
    %c0_i32 = arith.constant 0 : i32
    %c0_i32_0 = arith.constant 0 : i32
    return %arg0, %c0_i32 : i32, i32
  }
  func.func @transform_1(%arg0: i32) -> (i32, i32, i32) {
    %c0_i32 = arith.constant 0 : i32
    %c0_i32_0 = arith.constant 0 : i32
    %c0_i32_1 = arith.constant 0 : i32
    %c0_i32_2 = arith.constant 0 : i32
    return %c0_i32, %c0_i32_0, %c0_i32_1 : i32, i32, i32
  }
  func.func @transform_2(%arg0: i32) -> (i32, i32, i32) {
    %c0_i32 = arith.constant 0 : i32
    %c0_i32_0 = arith.constant 0 : i32
    %c0_i32_1 = arith.constant 0 : i32
    %c0_i32_2 = arith.constant 0 : i32
    return %c0_i32, %c0_i32_0, %c0_i32_1 : i32, i32, i32
  }
  func.func @transform_3(%arg0: i32) -> (i32, i32) {
    %c0_i32 = arith.constant 0 : i32
    %c0_i32_0 = arith.constant 0 : i32
    return %arg0, %c0_i32 : i32, i32
  }
}

</mosaic_0001>

<bundles_post_ra>
// kernel: tpu_custom_call.1
= control target key start
LH: loop header
LB: loop body
LE: loop exit
PB: predicated region body
PF: predicated region fallthrough
CT: control target
= control target key end

     0   :  { %8 = vsyncpa [#allocation3], 0  ;;  %s1160_s0 = inlined_call_operand.hbm [shape: f32[8,128], index: 0, kind: input, shape index: {}]   ;;  %s1161_s1 = inlined_call_operand.hbm [shape: f32[5,128,128], index: 1, kind: input, shape index: {}]   ;;  %s1162_s2 = inlined_call_operand.vmem [shape: f32[5,1,128], index: 2, kind: input, shape index: {}]   ;;  %s1163_s3 = inlined_call_operand.hbm [shape: f32[8,128], index: 3, kind: output, shape index: {}]  }
   0x1   :  { %9 = vsyncpa [#allocation6], 0 }
   0x2   :  { %10 = vsyncpa [#allocation4], 0  ;;  %s1020_s12 = smov [#allocation2]   ;;  %s1021_s14 = smov [#allocation5]  }
   0x3   :  { %s17_s13 = sshll.u32 %s1020_s12, 4  ;;  %s26_s15 = sshll.u32 %s1021_s14, 4  ;;  %s18_s13 = int_to_ptr.vmem [resolvable:$true] %s17_s13  ;;  %s1048_s15 = int_to_ptr.vmem [resolvable:$true] %s26_s15 }
   0x4   :  { %s948_s18 = scalar_lea.hbm %s1160_s0, 128 }
   0x5   :  { %p949_p0 = scmp.ne.s32.totalorder %s1160_s0, %s948_s18  ;;  %p952_p1 = scmp.lt.u32.totalorder %s948_s18, %s1160_s0 }
   0x7   :  { %p954_p2 = pnand %p952_p1, %p949_p0 }
   0x9   :  { %957 = shalt.err (!%p954_p2)
}
   0xa   :  { %s958_s23 = scalar_lea.vmem %s18_s13, 128  ;;  %p963_p4 = scmp.lt.s32.totalorder %s18_s13, %s18_s13 }
   0xb   :  { %p959_p3 = scmp.ne.s32.totalorder %s18_s13, %s958_s23  ;;  %p964_p5 = scmp.lt.s32.totalorder %s958_s23, %s958_s23 }
   0xd   :  { %p965_p6 = por %p964_p5, %p963_p4 }
   0xf   :  { %p966_p7 = pnand %p965_p6, %p959_p3 }
  0x11   :  { %969 = shalt.err (!%p966_p7)
}
  0x12   :  { %20 = dma.hbm_to_vmem [thread:$0]  %s1160_s0, 128, %s18_s13, [#allocation3]  }
  0x13   :  { %s970_s28 = scalar_lea.hbm %s1161_s1, 10240 }
  0x14   :  { %p971_p8 = scmp.ne.s32.totalorder %s1161_s1, %s970_s28  ;;  %p974_p9 = scmp.lt.u32.totalorder %s970_s28, %s1161_s1 }
  0x16   :  { %p976_p10 = pnand %p974_p9, %p971_p8 }
  0x18   :  { %979 = shalt.err (!%p976_p10)
}
  0x19   :  { %s980_s6 = scalar_lea.vmem %s1048_s15, 10240  ;;  %p985_p12 = scmp.lt.s32.totalorder %s1048_s15, %s1048_s15 }
  0x1a   :  { %p981_p11 = scmp.ne.s32.totalorder %s1048_s15, %s980_s6  ;;  %p986_p13 = scmp.lt.s32.totalorder %s980_s6, %s980_s6 }
  0x1c   :  { %p987_p0 = por %p986_p13, %p985_p12 }
  0x1e   :  { %p988_p1 = pnand %p987_p0, %p981_p11 }
  0x20   :  { %991 = shalt.err (!%p988_p1)
}
  0x21   :  { %s1022_s0 = smov 128   ;;  %s1023_s7 = smov 8  }
  0x22   :  { %32 = dma.hbm_to_vmem [thread:$0]  %s1161_s1, 10240, %s1048_s15, [#allocation6], %s1022_s0, %s1022_s0, %s1023_s7  }
  0x23   :  { %1014 = dma.done.wait [#allocation3], 128  }
  0x24   :  { %1015 = vsyncadd [#allocation3], 4294967168 }
  0x25   :  { %1016 = dma.done.wait [#allocation6], 10240  }
  0x26   :  { %1017 = vsyncadd [#allocation6], 4294957056  ;;  %v1024_v0 = vmov 0.0|0.0   ;;  %vm1025_vm0 = vmmov 0   ;;  %v1026_v1 = vmov 0.0   ;;  %v42_v2 = vld [vmem:[#allocation5] sm:$0xff] }
  0x27   :  { %816 = vmatprep.subr.bf16.mxu0 %v1024_v0  ;;  %673 = vmatprep.mubr.msk.f32.mxu0 %vm1025_vm0, %v1026_v1  ;;  %v43_v3 = vld [vmem:[#allocation5 + $0x8] sm:$0xff]  ;;  %v44_v4 = vld [vmem:[#allocation5 + $0x10] sm:$0xff]  ;;  %v45_v6 = vld [vmem:[#allocation5 + $0x18] sm:$0xff]  ;;  %s1027_s19 = smov [#allocation7]  }
  0x28   :  { %840 = vmatprep.subr.bf16.mxu1 %v1024_v0  ;;  %708 = vmatprep.mubr.msk.f32.mxu1 %vm1025_vm0, %v1026_v1  ;;  %v817_v5 = vpack.c.bf16 %v43_v3, %v42_v2  ;;  %v820_v7 = vpack.c.bf16 %v45_v6, %v44_v4  ;;  %v46_v8 = vld [vmem:[#allocation5 + $0x20] sm:$0xff]  ;;  %v47_v9 = vld [vmem:[#allocation5 + $0x28] sm:$0xff]  ;;  %v139_v12 = vld [vmem:[#allocation5 + $0x90] sm:$0xff]  ;;  %s537_s20 = sshll.u32 %s1027_s19, 4  ;;  %s538_s20 = int_to_ptr.vmem [resolvable:$true] %s537_s20 }
  0x29   :  { %v137_v10 = vld [vmem:[#allocation5 + $0x80] sm:$0xff]  ;;  %v138_v11 = vld [vmem:[#allocation5 + $0x88] sm:$0xff]  ;;  %v140_v13 = vld [vmem:[#allocation5 + $0x98] sm:$0xff]  ;;  %v823_v14 = vpack.c.bf16 %v47_v9, %v46_v8  ;;  %p997_p3 = scmp.lt.s32.totalorder %s538_s20, %s538_s20 }
  0x2a   :  { %818 = vmatpush3.bf16.msra.mxu0 %v817_v5  ;;  %v841_v15 = vpack.c.bf16 %v138_v11, %v137_v10  ;;  %v48_v16 = vld [vmem:[#allocation5 + $0x30] sm:$0xff]  ;;  %v49_v17 = vld [vmem:[#allocation5 + $0x38] sm:$0xff]  ;;  %v844_v18 = vpack.c.bf16 %v140_v13, %v139_v12  ;;  %v141_v19 = vld [vmem:[#allocation5 + $0xa0] sm:$0xff] }
  0x2b   :  { %819 = vmatprep.subr.bf16.mxu0 %v1024_v0  ;;  %v142_v20 = vld [vmem:[#allocation5 + $0xa8] sm:$0xff]  ;;  %v826_v21 = vpack.c.bf16 %v49_v17, %v48_v16  ;;  %v50_v22 = vld [vmem:[#allocation5 + $0x40] sm:$0xff]  ;;  %v143_v25 = vld [vmem:[#allocation5 + $0xb0] sm:$0xff] }
  0x2c   :  { %842 = vmatpush3.bf16.msra.mxu1 %v841_v15  ;;  %v51_v23 = vld [vmem:[#allocation5 + $0x48] sm:$0xff]  ;;  %v847_v24 = vpack.c.bf16 %v142_v20, %v141_v19  ;;  %v144_v26 = vld [vmem:[#allocation5 + $0xb8] sm:$0xff]  ;;  %v52_v28 = vld [vmem:[#allocation5 + $0x50] sm:$0xff] }
  0x2d   :  { %843 = vmatprep.subr.bf16.mxu1 %v1024_v0  ;;  %v829_v27 = vpack.c.bf16 %v51_v23, %v50_v22  ;;  %v53_v29 = vld [vmem:[#allocation5 + $0x58] sm:$0xff]  ;;  %v850_v30 = vpack.c.bf16 %v144_v26, %v143_v25  ;;  %v145_v31 = vld [vmem:[#allocation5 + $0xc0] sm:$0xff]  ;;  %v146_v32 = vld [vmem:[#allocation5 + $0xc8] sm:$0xff] }
  0x2e   :  { %821 = vmatpush3.bf16.msra.mxu0 %v820_v7  ;;  %v832_v33 = vpack.c.bf16 %v53_v29, %v52_v28  ;;  %v54_v34 = vld [vmem:[#allocation5 + $0x60] sm:$0xff]  ;;  %v55_v35 = vld [vmem:[#allocation5 + $0x68] sm:$0xff]  ;;  %v853_v36 = vpack.c.bf16 %v146_v32, %v145_v31  ;;  %v147_v37 = vld [vmem:[#allocation5 + $0xd0] sm:$0xff] }
  0x2f   :  { %822 = vmatprep.subr.bf16.mxu0 %v1024_v0  ;;  %v148_v38 = vld [vmem:[#allocation5 + $0xd8] sm:$0xff]  ;;  %v835_v39 = vpack.c.bf16 %v55_v35, %v54_v34  ;;  %v56_v40 = vld [vmem:[#allocation5 + $0x70] sm:$0xff]  ;;  %v149_v43 = vld [vmem:[#allocation5 + $0xe0] sm:$0xff] }
  0x30   :  { %845 = vmatpush3.bf16.msra.mxu1 %v844_v18  ;;  %v57_v41 = vld [vmem:[#allocation5 + $0x78] sm:$0xff]  ;;  %v856_v42 = vpack.c.bf16 %v148_v38, %v147_v37  ;;  %v150_v44 = vld [vmem:[#allocation5 + $0xe8] sm:$0xff]  ;;  %v151_v48 = vld [vmem:[#allocation5 + $0xf0] sm:$0xff] }
  0x31   :  { %846 = vmatprep.subr.bf16.mxu1 %v1024_v0  ;;  %v838_v45 = vpack.c.bf16 %v57_v41, %v56_v40  ;;  %v859_v46 = vpack.c.bf16 %v150_v44, %v149_v43  ;;  %v41_v47 = vld [vmem:[#allocation2] sm:$0xff]  ;;  %v233_v51 = vld [vmem:[#allocation5 + $0x100] sm:$0xff]  ;;  %v234_v52 = vld [vmem:[#allocation5 + $0x108] sm:$0xff] }
  0x32   :  { %824 = vmatpush3.bf16.msra.mxu0 %v823_v14  ;;  %v152_v49 = vld [vmem:[#allocation5 + $0xf8] sm:$0xff]  ;;  %v235_v53 = vld [vmem:[#allocation5 + $0x110] sm:$0xff]  ;;  %v865_v54 = vpack.c.bf16 %v234_v52, %v233_v51  ;;  %v237_v57 = vld [vmem:[#allocation5 + $0x120] sm:$0xff] }
  0x33   :  { %825 = vmatprep.subr.bf16.mxu0 %v1024_v0  ;;  %v862_v50 = vpack.c.bf16 %v152_v49, %v151_v48  ;;  %v236_v55 = vld [vmem:[#allocation5 + $0x118] sm:$0xff]  ;;  %v238_v58 = vld [vmem:[#allocation5 + $0x128] sm:$0xff]  ;;  %v239_v60 = vld [vmem:[#allocation5 + $0x130] sm:$0xff] }
  0x34   :  { %848 = vmatpush3.bf16.msra.mxu1 %v847_v24  ;;  %v868_v56 = vpack.c.bf16 %v236_v55, %v235_v53  ;;  %v871_v59 = vpack.c.bf16 %v238_v58, %v237_v57  ;;  %v240_v61 = vld [vmem:[#allocation5 + $0x138] sm:$0xff]  ;;  %v241_v63 = vld [vmem:[#allocation5 + $0x140] sm:$0xff]  ;;  %v242_v2 = vld [vmem:[#allocation5 + $0x148] sm:$0xff] }
  0x35   :  { %849 = vmatprep.subr.bf16.mxu1 %v1024_v0  ;;  %v874_v62 = vpack.c.bf16 %v240_v61, %v239_v60  ;;  %v877_v3 = vpack.c.bf16 %v242_v2, %v241_v63  ;;  %v243_v4 = vld [vmem:[#allocation5 + $0x150] sm:$0xff]  ;;  %v244_v5 = vld [vmem:[#allocation5 + $0x158] sm:$0xff]  ;;  %v245_v7 = vld [vmem:[#allocation5 + $0x160] sm:$0xff] }
  0x36   :  { %827 = vmatpush3.bf16.msra.mxu0 %v826_v21  ;;  %v880_v6 = vpack.c.bf16 %v244_v5, %v243_v4  ;;  %v246_v8 = vld [vmem:[#allocation5 + $0x168] sm:$0xff]  ;;  %v547_v10 = vld [vmem:[%s1162_s2] ss:$0 sm:$0xff]  ;;  %v247_v15 = vld [vmem:[#allocation5 + $0x170] sm:$0xff] }
  0x37   :  { %828 = vmatprep.subr.bf16.mxu0 %v1024_v0  ;;  %v883_v9 = vpack.c.bf16 %v246_v8, %v245_v7  ;;  %v248_v16 = vld [vmem:[#allocation5 + $0x178] sm:$0xff]  ;;  %v330_v18 = vld [vmem:[#allocation5 + $0x180] sm:$0xff]  ;;  %v331_v19 = vld [vmem:[#allocation5 + $0x188] sm:$0xff] }
  0x38   :  { %851 = vmatpush3.bf16.msra.mxu1 %v850_v30  ;;  %v886_v17 = vpack.c.bf16 %v248_v16, %v247_v15  ;;  %v332_v20 = vld [vmem:[#allocation5 + $0x190] sm:$0xff]  ;;  %v889_v21 = vpack.c.bf16 %v331_v19, %v330_v18  ;;  %v333_v22 = vld [vmem:[#allocation5 + $0x198] sm:$0xff]  ;;  %v334_v24 = vld [vmem:[#allocation5 + $0x1a0] sm:$0xff] }
  0x39   :  { %852 = vmatprep.subr.bf16.mxu1 %v1024_v0  ;;  %v892_v23 = vpack.c.bf16 %v333_v22, %v332_v20  ;;  %v335_v25 = vld [vmem:[#allocation5 + $0x1a8] sm:$0xff]  ;;  %v337_v28 = vld [vmem:[#allocation5 + $0x1b8] sm:$0xff]  ;;  %v338_v30 = vld [vmem:[#allocation5 + $0x1c0] sm:$0xff] }
  0x3a   :  { %830 = vmatpush3.bf16.msra.mxu0 %v829_v27  ;;  %v895_v26 = vpack.c.bf16 %v335_v25, %v334_v24  ;;  %v336_v27 = vld [vmem:[#allocation5 + $0x1b0] sm:$0xff]  ;;  %v339_v31 = vld [vmem:[#allocation5 + $0x1c8] sm:$0xff]  ;;  %v341_v34 = vld [vmem:[#allocation5 + $0x1d8] sm:$0xff] }
  0x3b   :  { %831 = vmatprep.subr.bf16.mxu0 %v1024_v0  ;;  %v898_v29 = vpack.c.bf16 %v337_v28, %v336_v27  ;;  %v901_v32 = vpack.c.bf16 %v339_v31, %v338_v30  ;;  %v342_v41 = vld [vmem:[#allocation5 + $0x1e0] sm:$0xff]  ;;  %v344_v44 = vld [vmem:[#allocation5 + $0x1f0] sm:$0xff]  ;;  %v427_v48 = vld [vmem:[#allocation5 + $0x208] sm:$0xff] }
  0x3c   :  { %854 = vmatpush3.bf16.msra.mxu1 %v853_v36  ;;  %v549_v36 = vld [vmem:[%s1162_s2 + $0x1] ss:$0 sm:$0xff]  ;;  %v428_v49 = vld [vmem:[#allocation5 + $0x210] sm:$0xff]  ;;  %v431_v53 = vld [vmem:[#allocation5 + $0x228] sm:$0xff] }
  0x3d   :  { %855 = vmatprep.subr.bf16.mxu1 %v1024_v0  ;;  %v429_v51 = vld [vmem:[#allocation5 + $0x218] sm:$0xff]  ;;  %v432_v55 = vld [vmem:[#allocation5 + $0x230] sm:$0xff]  ;;  %v434_v58 = vld [vmem:[#allocation5 + $0x240] sm:$0xff] }
  0x3e   :  { %833 = vmatpush3.bf16.msra.mxu0 %v832_v33  ;;  %v340_v33 = vld [vmem:[#allocation5 + $0x1d0] sm:$0xff]  ;;  %v916_v52 = vpack.c.bf16 %v429_v51, %v428_v49  ;;  %v438_v2 = vld [vmem:[#allocation5 + $0x260] sm:$0xff]  ;;  %v553_v15 = vld [vmem:[%s1162_s2 + $0x3] ss:$0 sm:$0xff] }
  0x3f   :  { %834 = vmatprep.subr.bf16.mxu0 %v1024_v0  ;;  %v904_v35 = vpack.c.bf16 %v341_v34, %v340_v33  ;;  %v436_v61 = vld [vmem:[#allocation5 + $0x250] sm:$0xff] }
  0x40   :  { %857 = vmatpush3.bf16.msra.mxu1 %v856_v42  ;;  %v343_v42 = vld [vmem:[#allocation5 + $0x1e8] sm:$0xff] }
  0x41   :  { %858 = vmatprep.subr.bf16.mxu1 %v1024_v0  ;;  %v907_v43 = vpack.c.bf16 %v343_v42, %v342_v41 }
  0x42   :  { %836 = vmatpush3.bf16.msra.mxu0 %v835_v39 }
  0x43   :  { %837 = vmatprep.subr.bf16.mxu0 %v1024_v0 }
  0x44   :  { %860 = vmatpush3.bf16.msra.mxu1 %v859_v46 }
  0x45   :  { %861 = vmatprep.subr.bf16.mxu1 %v1024_v0 }
  0x46   :  { %839 = vmatpush3.bf16.msra.mxu0 %v838_v45  ;;  %v345_v45 = vld [vmem:[#allocation5 + $0x1f8] sm:$0xff] }
  0x47   :  { %864 = vmatprep.subr.bf16.mxu0 %v1024_v0  ;;  %v910_v46 = vpack.c.bf16 %v345_v45, %v344_v44 }
  0x48   :  { %863 = vmatpush3.bf16.msra.mxu1 %v862_v50 }
  0x49   :  { %674 = vmatmul.mubr.f32.vlgmr.msra.gmra.mrb[0].mxu0 %v41_v47  ;;  %888 = vmatprep.subr.bf16.mxu1 %v1024_v0  ;;  %v426_v47 = vld [vmem:[#allocation5 + $0x200] sm:$0xff] }
  0x4a   :  { %743 = vmatprep.mubr.msk.f32.mxu0 %vm1025_vm0, %v1026_v1  ;;  %866 = vmatpush3.bf16.msra.mxu0 %v865_v54  ;;  %v913_v50 = vpack.c.bf16 %v427_v48, %v426_v47 }
  0x4b   :  { %867 = vmatprep.subr.bf16.mxu0 %v1024_v0 }
  0x4e   :  { %869 = vmatpush3.bf16.msra.mxu0 %v868_v56  ;;  %v433_v56 = vld [vmem:[#allocation5 + $0x238] sm:$0xff] }
  0x4f   :  { %870 = vmatprep.subr.bf16.mxu0 %v1024_v0  ;;  %v922_v57 = vpack.c.bf16 %v433_v56, %v432_v55 }
  0x52   :  { %872 = vmatpush3.bf16.msra.mxu0 %v871_v59  ;;  %v435_v59 = vld [vmem:[#allocation5 + $0x248] sm:$0xff] }
  0x53   :  { %873 = vmatprep.subr.bf16.mxu0 %v1024_v0  ;;  %v925_v60 = vpack.c.bf16 %v435_v59, %v434_v58 }
  0x56   :  { %875 = vmatpush3.bf16.msra.mxu0 %v874_v62  ;;  %v437_v62 = vld [vmem:[#allocation5 + $0x258] sm:$0xff] }
  0x57   :  { %876 = vmatprep.subr.bf16.mxu0 %v1024_v0  ;;  %v928_v63 = vpack.c.bf16 %v437_v62, %v436_v61 }
  0x5a   :  { %878 = vmatpush3.bf16.msra.mxu0 %v877_v3  ;;  %v439_v3 = vld [vmem:[#allocation5 + $0x268] sm:$0xff] }
  0x5b   :  { %879 = vmatprep.subr.bf16.mxu0 %v1024_v0  ;;  %v931_v4 = vpack.c.bf16 %v439_v3, %v438_v2 }
  0x5e   :  { %881 = vmatpush3.bf16.msra.mxu0 %v880_v6  ;;  %v551_v6 = vld [vmem:[%s1162_s2 + $0x2] ss:$0 sm:$0xff] }
  0x5f   :  { %882 = vmatprep.subr.bf16.mxu0 %v1024_v0 }
  0x62   :  { %884 = vmatpush3.bf16.msra.mxu0 %v883_v9 }
  0x63   :  { %885 = vmatprep.subr.bf16.mxu0 %v1024_v0 }
  0x66   :  { %887 = vmatpush3.bf16.msra.mxu0 %v886_v17 }
  0x67   :  { %912 = vmatprep.subr.bf16.mxu0 %v1024_v0 }
 0x11c   :  { %v131_v11 = vpop.f32.mrb[0].mxu0 }
 0x11d   :  { %v1113_v12 = vadd.f32 %v547_v10, %v131_v11  ;;  %v675_v13 = vpop.f32.mrb[1].mxu0  ;;  %v440_v11 = vld [vmem:[#allocation5 + $0x270] sm:$0xff] }
 0x11e   :  { %v441_v13 = vld [vmem:[#allocation5 + $0x278] sm:$0xff] }
 0x11f   :  { %v135_v14 = vmax.f32 %v1113_v12, 0.0 }
 0x121   :  { %709 = vmatmul.mubr.f32.vlgmr.msra.gmra.mrb[0].mxu1 %v135_v14  ;;  %v934_v14 = vpack.c.bf16 %v441_v13, %v440_v11 }
 0x122   :  { %778 = vmatprep.mubr.msk.f32.mxu1 %vm1025_vm0, %v1026_v1  ;;  %890 = vmatpush3.bf16.msra.mxu1 %v889_v21 }
 0x123   :  { %891 = vmatprep.subr.bf16.mxu1 %v1024_v0 }
 0x126   :  { %893 = vmatpush3.bf16.msra.mxu1 %v892_v23 }
 0x127   :  { %894 = vmatprep.subr.bf16.mxu1 %v1024_v0 }
 0x12a   :  { %896 = vmatpush3.bf16.msra.mxu1 %v895_v26 }
 0x12b   :  { %897 = vmatprep.subr.bf16.mxu1 %v1024_v0 }
 0x12e   :  { %899 = vmatpush3.bf16.msra.mxu1 %v898_v29 }
 0x12f   :  { %900 = vmatprep.subr.bf16.mxu1 %v1024_v0 }
 0x132   :  { %902 = vmatpush3.bf16.msra.mxu1 %v901_v32 }
 0x133   :  { %903 = vmatprep.subr.bf16.mxu1 %v1024_v0 }
 0x136   :  { %905 = vmatpush3.bf16.msra.mxu1 %v904_v35 }
 0x137   :  { %906 = vmatprep.subr.bf16.mxu1 %v1024_v0 }
 0x13a   :  { %908 = vmatpush3.bf16.msra.mxu1 %v907_v43 }
 0x13b   :  { %909 = vmatprep.subr.bf16.mxu1 %v1024_v0 }
 0x13e   :  { %911 = vmatpush3.bf16.msra.mxu1 %v910_v46 }
 0x1f4   :  { %v227_v37 = vpop.f32.mrb[0].mxu1 }
 0x1f5   :  { %v228_v38 = vadd.f32 %v549_v36, %v227_v37  ;;  %v710_v39 = vpop.f32.mrb[1].mxu1 }
 0x1f7   :  { %v231_v40 = vmax.f32 %v228_v38, 0.0 }
 0x1f9   :  { %744 = vmatmul.mubr.f32.vlgmr.msra.gmra.mrb[2].mxu0 %v231_v40 }
 0x1fa   :  { %813 = vmatprep.mubr.msk.f32.mxu0 %vm1025_vm0, %v1026_v1  ;;  %914 = vmatpush3.bf16.msra.mxu0 %v913_v50  ;;  %v430_v1 = vld [vmem:[#allocation5 + $0x220] sm:$0xff] }
 0x1fb   :  { %915 = vmatprep.subr.bf16.mxu0 %v1024_v0  ;;  %v919_v54 = vpack.c.bf16 %v431_v53, %v430_v1 }
 0x1fe   :  { %917 = vmatpush3.bf16.msra.mxu0 %v916_v52 }
 0x1ff   :  { %918 = vmatprep.subr.bf16.mxu0 %v1024_v0 }
 0x202   :  { %920 = vmatpush3.bf16.msra.mxu0 %v919_v54 }
 0x203   :  { %921 = vmatprep.subr.bf16.mxu0 %v1024_v0 }
 0x206   :  { %923 = vmatpush3.bf16.msra.mxu0 %v922_v57 }
 0x207   :  { %924 = vmatprep.subr.bf16.mxu0 %v1024_v0 }
 0x20a   :  { %926 = vmatpush3.bf16.msra.mxu0 %v925_v60 }
 0x20b   :  { %927 = vmatprep.subr.bf16.mxu0 %v1024_v0 }
 0x20e   :  { %929 = vmatpush3.bf16.msra.mxu0 %v928_v63 }
 0x20f   :  { %930 = vmatprep.subr.bf16.mxu0 %v1024_v0 }
 0x212   :  { %932 = vmatpush3.bf16.msra.mxu0 %v931_v4 }
 0x213   :  { %933 = vmatprep.subr.bf16.mxu0 %v1024_v0 }
 0x216   :  { %935 = vmatpush3.bf16.msra.mxu0 %v934_v14 }
 0x2cc   :  { %v315_v5 = vpop.f32.mrb[2].mxu0 }
 0x2cd   :  { %v316_v7 = vadd.f32 %v315_v5, %v1113_v12  ;;  %v745_v8 = vpop.f32.mrb[3].mxu0  ;;  %v555_v12 = vld [vmem:[%s1162_s2 + $0x4] ss:$0 sm:$0xff]  ;;  %s992_s2 = scalar_lea.vmem %s538_s20, 128 }
 0x2ce   :  { %p993_p2 = scmp.ne.s32.totalorder %s538_s20, %s992_s2  ;;  %p998_p4 = scmp.lt.s32.totalorder %s992_s2, %s992_s2 }
 0x2cf   :  { %v327_v9 = vadd.f32 %v551_v6, %v316_v7 }
 0x2d0   :  { %p999_p5 = por %p998_p4, %p997_p3 }
 0x2d1   :  { %v328_v10 = vmax.f32 %v327_v9, 0.0 }
 0x2d2   :  { %p1000_p6 = pnand %p999_p5, %p993_p2 }
 0x2d3   :  { %779 = vmatmul.mubr.f32.vlgmr.msra.gmra.mrb[2].mxu1 %v328_v10 }
 0x3a6   :  { %v420_v0 = vpop.f32.mrb[2].mxu1 }
 0x3a7   :  { %v421_v16 = vadd.f32 %v553_v15, %v420_v0  ;;  %v780_v17 = vpop.f32.mrb[3].mxu1 }
 0x3a9   :  { %v424_v18 = vmax.f32 %v421_v16, 0.0 }
 0x3ab   :  { %814 = vmatmul.mubr.f32.vlgmr.msra.gmra.mrb[4].mxu0 %v424_v18 }
 0x47e   :  { %v516_v19 = vpop.f32.mrb[4].mxu0 }
 0x47f   :  { %v517_v20 = vadd.f32 %v555_v12, %v516_v19  ;;  %v815_v21 = vpop.f32.mrb[5].mxu0 }
 0x481   :  { %520 = vmax.xlane.f32.xlu0 %v517_v20 }
 0x50e   :  { %v521_v22 = vpop.xlane.xlu0 %520 }
 0x50f   :  { %v522_v23 = vsub.f32 %v517_v20, %v521_v22 }
 0x511   :  { %v523_v24 = vmul.f32 1.442695, %v522_v23 }
 0x513   :  { %944 = vpow2.f32 %v523_v24 }
 0x51d   :  { %v945_v25 = vpop.eup %944 }
 0x51e   :  { %525 = vadd.xlane.f32.xlu0 %v945_v25 }
 0x5ab   :  { %v526_v26 = vpop.xlane.xlu0 %525 }
 0x5ac   :  { %946 = vlog2.f32 %v526_v26 }
 0x5b6   :  { %v947_v27 = vpop.eup %946 }
 0x5b7   :  { %v528_v28 = vmul.f32 0.6931472, %v947_v27 }
 0x5b9   :  { %v529_v29 = vsub.f32 %v522_v23, %v528_v28 }
 0x5bb   :  { %530 = vst [vmem:[#allocation7] sm:$0xff] %v529_v29 }
 0x5bc   :  { %1003 = shalt.err (!%p1000_p6)
}
 0x5bd   :  { %s1004_s23 = scalar_lea.hbm %s1163_s3, 128 }
 0x5be   :  { %p1005_p7 = scmp.ne.s32.totalorder %s1163_s3, %s1004_s23  ;;  %p1008_p8 = scmp.lt.u32.totalorder %s1004_s23, %s1163_s3 }
 0x5c0   :  { %p1010_p9 = pnand %p1008_p8, %p1005_p7 }
 0x5c2   :  { %1013 = shalt.err (!%p1010_p9)
}
 0x5c3   :  { %540 = dma.vmem_to_hbm [thread:$0]  %s538_s20, 128, %s1163_s3, [#allocation4]  }
 0x5c4   :  { %1018 = dma.done.wait [#allocation4], 128  }
 0x5c5   :  { %1019 = vsyncadd [#allocation4], 4294967168 }
 0x5c6   :  { %544 = vsyncpa [#allocation3], 1 }
 0x5c7   :  { %545 = vsyncpa [#allocation6], 1 }
 0x5c8   :  { %546 = vsyncpa [#allocation4], 1 }

</bundles_post_ra>
